<compile_context>
chip_gen: v5e
topology: v5e:2x2
jax: 0.10.0
libtpu: 0.0.40
codegen_flags: <defaults>
</compile_context>

<pallas_src>
import jax
import jax.numpy as jnp
from jax.experimental import pallas as pl
from jax.experimental.pallas import tpu as pltpu


D_IN, D_H1, D_OUT = 784, 300, 100
H_PAD = 384    # 300 -> 3 * 128 lanes
O_PAD = 128    # 100 -> 1 * 128 lanes


def _round_up(x, m):
    return (x + m - 1) // m * m


def _cdiv(a, b):
    return -(-a // b)


def mlp_kernel(x_ref, w1_ref, b1_ref, w2_ref, b2_ref, o_ref):
    # Fused 2-layer MLP. x arrives raw f32; cast to bf16 in-register for the
    # MXU, accumulate in f32, bias + ReLU epilogue in f32.
    x = x_ref[...].astype(jnp.bfloat16)
    h1 = jnp.dot(x, w1_ref[...], preferred_element_type=jnp.float32)
    h1 = jnp.maximum(h1 + b1_ref[...], 0.0)
    h2 = jnp.dot(h1.astype(jnp.bfloat16), w2_ref[...],
                 preferred_element_type=jnp.float32)
    h2 = jnp.maximum(h2 + b2_ref[...], 0.0)
    o_ref[...] = h2.astype(o_ref.dtype)


def prepare_params(w1, b1, w2, b2):
    """Pad/cast weights ONCE (hoisted out of the per-forward path).

    w1: (784, 300), b1: (300,), w2: (300, 100), b2: (100,)
    (torch Linear weights transposed, i.e. y = x @ W + b).
    """
    w1p = jnp.zeros((D_IN, H_PAD), jnp.bfloat16)
    w1p = w1p.at[:, :D_H1].set(w1.astype(jnp.bfloat16))
    b1p = jnp.zeros((1, H_PAD), jnp.float32)
    b1p = b1p.at[0, :D_H1].set(b1.reshape(-1).astype(jnp.float32))

    w2p = jnp.zeros((H_PAD, O_PAD), jnp.bfloat16)
    w2p = w2p.at[:D_H1, :D_OUT].set(w2.astype(jnp.bfloat16))
    b2p = jnp.zeros((1, O_PAD), jnp.float32)
    b2p = b2p.at[0, :D_OUT].set(b2.reshape(-1).astype(jnp.float32))
    return w1p, b1p, w2p, b2p


def _choose_tm(n, tm_max, sublane):
    n_r = _round_up(max(n, 1), sublane)
    if n_r <= sublane:
        return sublane
    # At least 2 grid steps whenever possible so v7x's two TensorCores both
    # get work via dimension_semantics=("parallel",).
    tm = _round_up(_cdiv(n_r, 2), sublane)
    return min(tm, tm_max)


def mynet_forward(x, params, *, tm_max=1024, out_dtype=jnp.float32):
    """x: any shape whose trailing dims flatten to 784 (e.g. (N, 1, 28, 28)).

    params: output of prepare_params(...).  Returns (N, 100) out_dtype.
    """
    w1p, b1p, w2p, b2p = params

    x2d = x.reshape(-1, D_IN)
    if x2d.dtype not in (jnp.float32, jnp.bfloat16):
        x2d = x2d.astype(jnp.float32)
    n = x2d.shape[0]

    # bf16 input tiles pack 16 rows / sublane-pair; f32 packs 8.
    sublane = 16 if x2d.dtype == jnp.bfloat16 else 8
    tm = _choose_tm(n, tm_max, sublane)
    n_pad = _round_up(n, tm)
    if n_pad != n:
        # Only in the ragged-batch case; zero rows stay zero and are sliced off.
        x2d = jnp.pad(x2d, ((0, n_pad - n), (0, 0)))

    grid = (n_pad // tm,)

    x_bytes = x2d.dtype.itemsize
    out_bytes = jnp.dtype(out_dtype).itemsize
    w_bytes = (D_IN * H_PAD + H_PAD * O_PAD) * 2 + (H_PAD + O_PAD) * 4

    cost = pl.CostEstimate(
        flops=2 * n_pad * (D_IN * H_PAD + H_PAD * O_PAD),
        transcendentals=0,
        bytes_accessed=int(n_pad * D_IN * x_bytes + n_pad * O_PAD * out_bytes
                           + w_bytes),
    )

    # Double-buffered streamed tiles + resident weights; pass an explicit VMEM
    # limit only if we might exceed v5e's 16 MiB default scoped-VMEM budget.
    est_vmem = 2 * tm * (D_IN * x_bytes + O_PAD * out_bytes) + 2 * w_bytes
    cp_kwargs = dict(dimension_semantics=("parallel",))
    if est_vmem > 12 * (1 << 20):
        cp_kwargs["vmem_limit_bytes"] = min(2 * est_vmem, 96 * (1 << 20))

    out = pl.pallas_call(
        mlp_kernel,
        out_shape=jax.ShapeDtypeStruct((n_pad, O_PAD), out_dtype),
        grid_spec=pltpu.PrefetchScalarGridSpec(
            num_scalar_prefetch=0,
            grid=grid,
            in_specs=[
                # streamed per-step activation tile (raw, unpadded K)
                pl.BlockSpec((tm, D_IN), lambda i: (i, 0)),
                # weights / biases: VMEM-resident across all grid steps
                pl.BlockSpec((D_IN, H_PAD), lambda i: (0, 0)),
                pl.BlockSpec((1, H_PAD), lambda i: (0, 0)),
                pl.BlockSpec((H_PAD, O_PAD), lambda i: (0, 0)),
                pl.BlockSpec((1, O_PAD), lambda i: (0, 0)),
            ],
            out_specs=pl.BlockSpec((tm, O_PAD), lambda i: (i, 0)),
        ),
        compiler_params=pltpu.CompilerParams(**cp_kwargs),
        cost_estimate=cost,
    )(x2d, w1p, b1p, w2p, b2p)

    # Strip batch padding and the zero-padded output features.
    return out[:n, :D_OUT]


def init_params(key):
    """Deterministic init mimicking nn.Linear's U(-1/sqrt(fan_in), 1/sqrt(fan_in))."""
    k1, k2, k3, k4 = jax.random.split(key, 4)
    bound1 = 1.0 / jnp.sqrt(784.0)
    bound2 = 1.0 / jnp.sqrt(300.0)
    w1 = jax.random.uniform(k1, (D_IN, D_H1), jnp.float32, -bound1, bound1)
    b1 = jax.random.uniform(k2, (D_H1,), jnp.float32, -bound1, bound1)
    w2 = jax.random.uniform(k3, (D_H1, D_OUT), jnp.float32, -bound2, bound2)
    b2 = jax.random.uniform(k4, (D_OUT,), jnp.float32, -bound2, bound2)
    return w1, b1, w2, b2


if __name__ == "__main__":
    key = jax.random.PRNGKey(0)
    kx, kp = jax.random.split(key)

    # Small MNIST-like batch: (N, C, H, W) = (8, 1, 28, 28) -> view(-1, 784).
    x = jax.random.normal(kx, (8, 1, 28, 28), jnp.float32)
    w1, b1, w2, b2 = init_params(kp)

    params = prepare_params(w1, b1, w2, b2)   # hoisted: pad/cast weights once
    out = mynet_forward(x, params)
    out = jax.block_until_ready(out)

    # Reference in plain JAX with the same bf16-in / f32-accumulate math.
    x2d = x.reshape(-1, D_IN)
    xb = x2d.astype(jnp.bfloat16).astype(jnp.float32)
    w1b = w1.astype(jnp.bfloat16).astype(jnp.float32)
    w2b = w2.astype(jnp.bfloat16).astype(jnp.float32)
    h1 = jnp.maximum(xb @ w1b + b1.reshape(1, -1), 0.0)
    h1b = h1.astype(jnp.bfloat16).astype(jnp.float32)
    ref = jnp.maximum(h1b @ w2b + b2.reshape(1, -1), 0.0)

    assert out.shape == (8, 100), out.shape
    assert jnp.allclose(out, ref, atol=2e-2, rtol=2e-2), "mismatch vs reference"

    print("KERNEL_OK")
</pallas_src>

<mosaic_0001>
module attributes {stable_mosaic.version = 11 : i64} {
  func.func @mlp_kernel(%arg0: i32, %arg1: memref<8x784xf32, #tpu.memory_space<vmem>>, %arg2: memref<784x384xbf16, #tpu.memory_space<vmem>>, %arg3: memref<1x384xf32, #tpu.memory_space<vmem>>, %arg4: memref<384x128xbf16, #tpu.memory_space<vmem>>, %arg5: memref<1x128xf32, #tpu.memory_space<vmem>>, %arg6: memref<8x128xf32, #tpu.memory_space<vmem>>) attributes {dimension_semantics = [#tpu.dimension_semantics<parallel>], iteration_bounds = array<i64: 1>, scalar_prefetch = 0 : i64, scratch_operands = 0 : i64, tpu.core_type = #tpu.core_type<tc>, window_params = [{transform_indices = @transform_0, window_bounds = array<i64: 8, 784>}, {pipeline_mode = #tpu.pipeline_mode<synchronous>, transform_indices = @transform_1, window_bounds = array<i64: 784, 384>}, {pipeline_mode = #tpu.pipeline_mode<synchronous>, transform_indices = @transform_2, window_bounds = array<i64: 1, 384>}, {pipeline_mode = #tpu.pipeline_mode<synchronous>, transform_indices = @transform_3, window_bounds = array<i64: 384, 128>}, {pipeline_mode = #tpu.pipeline_mode<synchronous>, transform_indices = @transform_4, window_bounds = array<i64: 1, 128>}, {transform_indices = @transform_5, window_bounds = array<i64: 8, 128>}]} {
    %c0 = arith.constant 0 : index
    %c0_0 = arith.constant 0 : index
    %0 = vector.load %arg1[%c0, %c0_0] : memref<8x784xf32, #tpu.memory_space<vmem>>, vector<8x784xf32>
    %1 = arith.truncf %0 : vector<8x784xf32> to vector<8x784xbf16>
    %c0_1 = arith.constant 0 : index
    %c0_2 = arith.constant 0 : index
    %2 = vector.load %arg2[%c0_1, %c0_2] : memref<784x384xbf16, #tpu.memory_space<vmem>>, vector<784x384xbf16>
    %cst = arith.constant dense<0.000000e+00> : vector<8x384xf32>
    %3 = tpu.matmul %1, %2, %cst {dimension_numbers = #tpu.dot_dimension_numbers<[1], [0], [0], [1], [0, 0, 1, 1], [], []>} : vector<8x784xbf16>, vector<784x384xbf16>, vector<8x384xf32> -> vector<8x384xf32>
    %c0_3 = arith.constant 0 : index
    %c0_4 = arith.constant 0 : index
    %4 = vector.load %arg3[%c0_3, %c0_4] : memref<1x384xf32, #tpu.memory_space<vmem>>, vector<1x384xf32>
    %5 = vector.broadcast %4 : vector<1x384xf32> to vector<8x384xf32>
    %6 = arith.addf %3, %5 : vector<8x384xf32>
    %cst_5 = arith.constant 0.000000e+00 : f32
    %7 = vector.broadcast %cst_5 : f32 to vector<8x384xf32>
    %8 = arith.maximumf %6, %7 : vector<8x384xf32>
    %9 = arith.truncf %8 : vector<8x384xf32> to vector<8x384xbf16>
    %c0_6 = arith.constant 0 : index
    %c0_7 = arith.constant 0 : index
    %10 = vector.load %arg4[%c0_6, %c0_7] : memref<384x128xbf16, #tpu.memory_space<vmem>>, vector<384x128xbf16>
    %cst_8 = arith.constant dense<0.000000e+00> : vector<8x128xf32>
    %11 = tpu.matmul %9, %10, %cst_8 {dimension_numbers = #tpu.dot_dimension_numbers<[1], [0], [0], [1], [0, 0, 1, 1], [], []>} : vector<8x384xbf16>, vector<384x128xbf16>, vector<8x128xf32> -> vector<8x128xf32>
    %c0_9 = arith.constant 0 : index
    %c0_10 = arith.constant 0 : index
    %12 = vector.load %arg5[%c0_9, %c0_10] : memref<1x128xf32, #tpu.memory_space<vmem>>, vector<1x128xf32>
    %13 = vector.broadcast %12 : vector<1x128xf32> to vector<8x128xf32>
    %14 = arith.addf %11, %13 : vector<8x128xf32>
    %cst_11 = arith.constant 0.000000e+00 : f32
    %15 = vector.broadcast %cst_11 : f32 to vector<8x128xf32>
    %16 = arith.maximumf %14, %15 : vector<8x128xf32>
    %c0_12 = arith.constant 0 : index
    %c0_13 = arith.constant 0 : index
    %17 = vector.load %arg6[%c0_12, %c0_13] : memref<8x128xf32, #tpu.memory_space<vmem>>, vector<8x128xf32>
    tpu.vector_store %arg6[%c0_12, %c0_13], %16 {strides = array<i32>} : memref<8x128xf32, #tpu.memory_space<vmem>>, vector<8x128xf32>,
    return
  }
  func.func @transform_0(%arg0: i32) -> (i32, i32) {
    %c0_i32 = arith.constant 0 : i32
    %c0_i32_0 = arith.constant 0 : i32
    return %arg0, %c0_i32 : i32, i32
  }
  func.func @transform_1(%arg0: i32) -> (i32, i32) {
    %c0_i32 = arith.constant 0 : i32
    %c0_i32_0 = arith.constant 0 : i32
    %c0_i32_1 = arith.constant 0 : i32
    return %c0_i32, %c0_i32_0 : i32, i32
  }
  func.func @transform_2(%arg0: i32) -> (i32, i32) {
    %c0_i32 = arith.constant 0 : i32
    %c0_i32_0 = arith.constant 0 : i32
    %c0_i32_1 = arith.constant 0 : i32
    return %c0_i32, %c0_i32_0 : i32, i32
  }
  func.func @transform_3(%arg0: i32) -> (i32, i32) {
    %c0_i32 = arith.constant 0 : i32
    %c0_i32_0 = arith.constant 0 : i32
    %c0_i32_1 = arith.constant 0 : i32
    return %c0_i32, %c0_i32_0 : i32, i32
  }
  func.func @transform_4(%arg0: i32) -> (i32, i32) {
    %c0_i32 = arith.constant 0 : i32
    %c0_i32_0 = arith.constant 0 : i32
    %c0_i32_1 = arith.constant 0 : i32
    return %c0_i32, %c0_i32_0 : i32, i32
  }
  func.func @transform_5(%arg0: i32) -> (i32, i32) {
    %c0_i32 = arith.constant 0 : i32
    %c0_i32_0 = arith.constant 0 : i32
    return %arg0, %c0_i32 : i32, i32
  }
}

</mosaic_0001>

<bundles_post_ra>
// kernel: tpu_custom_call.1
= control target key start
LH: loop header
LB: loop body
LE: loop exit
PB: predicated region body
PF: predicated region fallthrough
CT: control target
= control target key end

     0   :  { %10 = vsyncpa [#allocation3], 0  ;;  %s2718_s0 = inlined_call_operand.hbm [shape: f32[8,784], index: 0, kind: input, shape index: {}]   ;;  %s2719_s1 = inlined_call_operand.hbm [shape: bf16[784,384], index: 1, kind: input, shape index: {}]   ;;  %s2720_s2 = inlined_call_operand.hbm [shape: f32[1,384], index: 2, kind: input, shape index: {}]   ;;  %s2721_s3 = inlined_call_operand.hbm [shape: bf16[384,128], index: 3, kind: input, shape index: {}]   ;;  %s2722_s4 = inlined_call_operand.vmem [shape: f32[1,128], index: 4, kind: input, shape index: {}]   ;;  %s2723_s5 = inlined_call_operand.hbm [shape: f32[8,128], index: 5, kind: output, shape index: {}]  }
   0x1   :  { %11 = vsyncpa [#allocation6], 0 }
   0x2   :  { %12 = vsyncpa [#allocation9], 0  ;;  %s29_s20 = sshll.u32 %s2719_s1, 4  ;;  %s30_s20 = int_to_ptr.hbm [resolvable:$true] %s29_s20 }
   0x3   :  { %13 = vsyncpa [#allocation4], 0  ;;  %s2618_s21 = smov [#allocation5]   ;;  %s19_s25 = sshll.u32 %s2718_s0, 4  ;;  %s20_s25 = int_to_ptr.hbm [resolvable:$true] %s19_s25 }
   0x4   :  { %s31_s22 = sshll.u32 %s2618_s21, 4  ;;  %s2619_s26 = smov 192   ;;  %s32_s22 = int_to_ptr.vmem [resolvable:$true] %s31_s22 }
   0x5   :  { %s2620_s27 = smov 12   ;;  %s2621_s28 = smov [#allocation2]  }
   0x6   :  { %37 = dma.hbm_to_vmem [thread:$0]  %s30_s20, 18816, %s32_s22, [#allocation6], %s2619_s26, %s2619_s26, %s2620_s27  }
   0x7   :  { %s21_s29 = sshll.u32 %s2621_s28, 4  ;;  %s43_s7 = sshll.u32 %s2720_s2, 4  ;;  %s22_s29 = int_to_ptr.vmem [resolvable:$true] %s21_s29  ;;  %s44_s7 = int_to_ptr.hbm [resolvable:$true] %s43_s7 }
   0x8   :  { %24 = dma.hbm_to_vmem [thread:$0]  %s20_s25, 896, %s22_s29, [#allocation3]  }
   0x9   :  { %s53_s9 = sshll.u32 %s2721_s3, 4  ;;  %s2622_s10 = smov [#allocation7]   ;;  %s54_s9 = int_to_ptr.hbm [resolvable:$true] %s53_s9 }
   0xa   :  { %s45_s11 = sshll.u32 %s2622_s10, 4  ;;  %s2623_s0 = smov [#allocation8]   ;;  %s46_s11 = int_to_ptr.vmem [resolvable:$true] %s45_s11 }
   0xb   :  { %48 = dma.hbm_to_vmem [thread:$0]  %s44_s7, 48, %s46_s11, [#allocation6]  }
   0xc   :  { %s55_s12 = sshll.u32 %s2623_s0, 4  ;;  %s2624_s13 = smov 64   ;;  %s56_s12 = int_to_ptr.vmem [resolvable:$true] %s55_s12 }
   0xd   :  { %s2625_s14 = smov 4  }
   0xe   :  { %61 = dma.hbm_to_vmem [thread:$0]  %s54_s9, 3072, %s56_s12, [#allocation9], %s2624_s13, %s2624_s13, %s2625_s14  }
   0xf   :  { %2610 = dma.done.wait [#allocation3], 896  }
  0x10   :  { %2611 = vsyncadd [#allocation3], 4294966400 }
  0x11   :  { %2612 = dma.done.wait [#allocation6], 18864  }
  0x12   :  { %2613 = vsyncadd [#allocation6], 4294948432 }
  0x13   :  { %2614 = dma.done.wait [#allocation9], 3072  }
  0x14   :  { %2615 = vsyncadd [#allocation9], 4294964224  ;;  %v1708_v0 = vld [vmem:[#allocation5 + $0xa8] sm:$0xf]  ;;  %v2331_v1 = vld [vmem:[#allocation5 + $0xb0] sm:$0xf0] }
  0x15   :  { %v1804_v2 = vld [vmem:[#allocation5 + $0x168] sm:$0xf]  ;;  %v1709_v3 = vor.u32 %v2331_v1, %v1708_v0  ;;  %v2355_v4 = vld [vmem:[#allocation5 + $0x170] sm:$0xf0]  ;;  %v1696_v11 = vld [vmem:[#allocation5 + $0x90] sm:$0xf] }
  0x16   :  { %v1900_v5 = vld [vmem:[#allocation5 + $0x228] sm:$0xf]  ;;  %v2379_v6 = vld [vmem:[#allocation5 + $0x230] sm:$0xf0]  ;;  %v1805_v7 = vor.u32 %v2355_v4, %v1804_v2  ;;  %v2328_v13 = vld [vmem:[#allocation5 + $0x98] sm:$0xf0] }
  0x17   :  { %v1901_v8 = vor.u32 %v2379_v6, %v1900_v5  ;;  %v1996_v9 = vld [vmem:[#allocation5 + $0x2e8] sm:$0xf]  ;;  %v2403_v10 = vld [vmem:[#allocation5 + $0x2f0] sm:$0xf0]  ;;  %1087 = vmatpush.bf16.msra.mxu0 %v1709_v3  ;;  %v1792_v14 = vld [vmem:[#allocation5 + $0x150] sm:$0xf]  ;;  %v1697_v16 = vor.u32 %v2328_v13, %v1696_v11 }
  0x18   :  { %v1997_v12 = vor.u32 %v2403_v10, %v1996_v9  ;;  %v2352_v15 = vld [vmem:[#allocation5 + $0x158] sm:$0xf0]  ;;  %1100 = vmatpush.bf16.msra.mxu1 %v1805_v7  ;;  %v1888_v18 = vld [vmem:[#allocation5 + $0x210] sm:$0xf]  ;;  %v1684_v23 = vld [vmem:[#allocation5 + $0x78] sm:$0xf] }
  0x19   :  { %1113 = vmatpush.bf16.msra.mxu2 %v1901_v8  ;;  %v1793_v17 = vor.u32 %v2352_v15, %v1792_v14  ;;  %v2376_v19 = vld [vmem:[#allocation5 + $0x218] sm:$0xf0]  ;;  %v1984_v20 = vld [vmem:[#allocation5 + $0x2d0] sm:$0xf]  ;;  %v2325_v24 = vld [vmem:[#allocation5 + $0x80] sm:$0xf0] }
  0x1a   :  { %1126 = vmatpush.bf16.msra.mxu3 %v1997_v12  ;;  %v1889_v21 = vor.u32 %v2376_v19, %v1888_v18  ;;  %v2400_v22 = vld [vmem:[#allocation5 + $0x2d8] sm:$0xf0]  ;;  %v1780_v26 = vld [vmem:[#allocation5 + $0x138] sm:$0xf]  ;;  %v2349_v27 = vld [vmem:[#allocation5 + $0x140] sm:$0xf0]  ;;  %v1685_v29 = vor.u32 %v2325_v24, %v1684_v23 }
  0x1b   :  { %v1985_v25 = vor.u32 %v2400_v22, %v1984_v20  ;;  %v1876_v28 = vld [vmem:[#allocation5 + $0x1f8] sm:$0xf]  ;;  %1088 = vmatpush.bf16.msra.mxu0 %v1697_v16  ;;  %v2373_v30 = vld [vmem:[#allocation5 + $0x200] sm:$0xf0]  ;;  %v1781_v33 = vor.u32 %v2349_v27, %v1780_v26  ;;  %v1672_v35 = vld [vmem:[#allocation5 + $0x60] sm:$0xf] }
  0x1c   :  { %v1972_v31 = vld [vmem:[#allocation5 + $0x2b8] sm:$0xf]  ;;  %v2397_v32 = vld [vmem:[#allocation5 + $0x2c0] sm:$0xf0]  ;;  %1101 = vmatpush.bf16.msra.mxu1 %v1793_v17  ;;  %v1877_v34 = vor.u32 %v2373_v30, %v1876_v28  ;;  %v2322_v36 = vld [vmem:[#allocation5 + $0x68] sm:$0xf0] }
  0x1d   :  { %1114 = vmatpush.bf16.msra.mxu2 %v1889_v21  ;;  %v1768_v37 = vld [vmem:[#allocation5 + $0x120] sm:$0xf]  ;;  %v1973_v38 = vor.u32 %v2397_v32, %v1972_v31  ;;  %v2346_v39 = vld [vmem:[#allocation5 + $0x128] sm:$0xf0]  ;;  %v1673_v44 = vor.u32 %v2322_v36, %v1672_v35  ;;  %v1660_v47 = vld [vmem:[#allocation5 + $0x48] sm:$0xf] }
  0x1e   :  { %1127 = vmatpush.bf16.msra.mxu3 %v1985_v25  ;;  %v1864_v40 = vld [vmem:[#allocation5 + $0x1e0] sm:$0xf]  ;;  %v2370_v41 = vld [vmem:[#allocation5 + $0x1e8] sm:$0xf0]  ;;  %v1769_v45 = vor.u32 %v2346_v39, %v1768_v37  ;;  %v2319_v48 = vld [vmem:[#allocation5 + $0x50] sm:$0xf0] }
  0x1f   :  { %v1960_v42 = vld [vmem:[#allocation5 + $0x2a0] sm:$0xf]  ;;  %v2394_v43 = vld [vmem:[#allocation5 + $0x2a8] sm:$0xf0]  ;;  %1089 = vmatpush.bf16.msra.mxu0 %v1685_v29  ;;  %v1865_v46 = vor.u32 %v2370_v41, %v1864_v40  ;;  %v1756_v49 = vld [vmem:[#allocation5 + $0x108] sm:$0xf]  ;;  %v1661_v56 = vor.u32 %v2319_v48, %v1660_v47 }
  0x20   :  { %1102 = vmatpush.bf16.msra.mxu1 %v1781_v33  ;;  %v1961_v50 = vor.u32 %v2394_v43, %v1960_v42  ;;  %v2343_v51 = vld [vmem:[#allocation5 + $0x110] sm:$0xf0]  ;;  %v1852_v52 = vld [vmem:[#allocation5 + $0x1c8] sm:$0xf]  ;;  %v1648_v59 = vld [vmem:[#allocation5 + $0x30] sm:$0xf] }
  0x21   :  { %1115 = vmatpush.bf16.msra.mxu2 %v1877_v34  ;;  %v2367_v53 = vld [vmem:[#allocation5 + $0x1d0] sm:$0xf0]  ;;  %v1948_v54 = vld [vmem:[#allocation5 + $0x288] sm:$0xf]  ;;  %v1757_v57 = vor.u32 %v2343_v51, %v1756_v49  ;;  %v2316_v60 = vld [vmem:[#allocation5 + $0x38] sm:$0xf0] }
  0x22   :  { %1128 = vmatpush.bf16.msra.mxu3 %v1973_v38  ;;  %v2391_v55 = vld [vmem:[#allocation5 + $0x290] sm:$0xf0]  ;;  %v1853_v58 = vor.u32 %v2367_v53, %v1852_v52  ;;  %v1744_v61 = vld [vmem:[#allocation5 + $0xf0] sm:$0xf]  ;;  %v2340_v63 = vld [vmem:[#allocation5 + $0xf8] sm:$0xf0]  ;;  %v1649_v4 = vor.u32 %v2316_v60, %v1648_v59 }
  0x23   :  { %1090 = vmatpush.bf16.msra.mxu0 %v1673_v44  ;;  %v1949_v62 = vor.u32 %v2391_v55, %v1948_v54  ;;  %v1840_v0 = vld [vmem:[#allocation5 + $0x1b0] sm:$0xf]  ;;  %v2364_v1 = vld [vmem:[#allocation5 + $0x1b8] sm:$0xf0]  ;;  %v1745_v5 = vor.u32 %v2340_v63, %v1744_v61  ;;  %v1636_v7 = vld [vmem:[#allocation5 + $0x18] sm:$0xf] }
  0x24   :  { %1103 = vmatpush.bf16.msra.mxu1 %v1769_v45  ;;  %v1936_v2 = vld [vmem:[#allocation5 + $0x270] sm:$0xf]  ;;  %v2388_v3 = vld [vmem:[#allocation5 + $0x278] sm:$0xf0]  ;;  %v1841_v6 = vor.u32 %v2364_v1, %v1840_v0  ;;  %v2313_v8 = vld [vmem:[#allocation5 + $0x20] sm:$0xf0] }
  0x25   :  { %1116 = vmatpush.bf16.msra.mxu2 %v1865_v46  ;;  %v1732_v9 = vld [vmem:[#allocation5 + $0xd8] sm:$0xf]  ;;  %v1937_v10 = vor.u32 %v2388_v3, %v1936_v2  ;;  %v2337_v11 = vld [vmem:[#allocation5 + $0xe0] sm:$0xf0]  ;;  %v1637_v16 = vor.u32 %v2313_v8, %v1636_v7  ;;  %v1624_v17 = vld [vmem:[#allocation5] sm:$0xf] }
  0x26   :  { %1129 = vmatpush.bf16.msra.mxu3 %v1961_v50  ;;  %v1828_v12 = vld [vmem:[#allocation5 + $0x198] sm:$0xf]  ;;  %v2361_v13 = vld [vmem:[#allocation5 + $0x1a0] sm:$0xf0]  ;;  %v2310_v18 = vld [vmem:[#allocation5 + $0x8] sm:$0xf0]  ;;  %v1733_v19 = vor.u32 %v2337_v11, %v1732_v9 }
  0x27   :  { %1091 = vmatpush.bf16.msra.mxu0 %v1661_v56  ;;  %v1924_v14 = vld [vmem:[#allocation5 + $0x258] sm:$0xf]  ;;  %v2385_v15 = vld [vmem:[#allocation5 + $0x260] sm:$0xf0]  ;;  %v1829_v20 = vor.u32 %v2361_v13, %v1828_v12  ;;  %v1720_v21 = vld [vmem:[#allocation5 + $0xc0] sm:$0xf]  ;;  %v1625_v31 = vor.u32 %v2310_v18, %v1624_v17 }
  0x28   :  { %1104 = vmatpush.bf16.msra.mxu1 %v1757_v57  ;;  %v2334_v22 = vld [vmem:[#allocation5 + $0xc8] sm:$0xf0]  ;;  %v1816_v23 = vld [vmem:[#allocation5 + $0x180] sm:$0xf]  ;;  %v1925_v24 = vor.u32 %v2385_v15, %v1924_v14  ;;  %v2092_v28 = vld [vmem:[#allocation5 + $0x3a8] sm:$0xf] }
  0x29   :  { %1117 = vmatpush.bf16.msra.mxu2 %v1853_v58  ;;  %v2358_v25 = vld [vmem:[#allocation5 + $0x188] sm:$0xf0]  ;;  %v1912_v26 = vld [vmem:[#allocation5 + $0x240] sm:$0xf]  ;;  %v2427_v29 = vld [vmem:[#allocation5 + $0x3b0] sm:$0xf0]  ;;  %v1721_v35 = vor.u32 %v2334_v22, %v1720_v21 }
  0x2a   :  { %1130 = vmatpush.bf16.msra.mxu3 %v1949_v62  ;;  %v2382_v27 = vld [vmem:[#allocation5 + $0x248] sm:$0xf0]  ;;  %v2188_v30 = vld [vmem:[#allocation5 + $0x468] sm:$0xf]  ;;  %v2451_v32 = vld [vmem:[#allocation5 + $0x470] sm:$0xf0]  ;;  %v1817_v36 = vor.u32 %v2358_v25, %v1816_v23  ;;  %v2093_v40 = vor.u32 %v2427_v29, %v2092_v28 }
  0x2b   :  { %1092 = vmatpush.bf16.msra.mxu0 %v1649_v4  ;;  %v2330_v33 = vld [vmem:[#allocation5 + $0xac] sm:$0xf]  ;;  %v1710_v34 = vld [vmem:[#allocation5 + $0xb4] sm:$0xf0]  ;;  %v2200_v37 = vld [vmem:[#allocation5 + $0x480] sm:$0xf]  ;;  %v1913_v39 = vor.u32 %v2382_v27, %v1912_v26  ;;  %v2189_v44 = vor.u32 %v2451_v32, %v2188_v30 }
  0x2c   :  { %1105 = vmatpush.bf16.msra.mxu1 %v1745_v5  ;;  %v2454_v38 = vld [vmem:[#allocation5 + $0x488] sm:$0xf0]  ;;  %v83_v41 = vld [vmem:[#allocation2 + $0x10] sm:$0xff]  ;;  %v1713_v45 = vor.u32 %v2330_v33, %v1710_v34  ;;  %v2080_v46 = vld [vmem:[#allocation5 + $0x390] sm:$0xf]  ;;  %vm1083_vm0 = vcmask 130048  }
  0x2d   :  { %1118 = vmatpush.bf16.msra.mxu2 %v1841_v6  ;;  %v2354_v42 = vld [vmem:[#allocation5 + $0x16c] sm:$0xf]  ;;  %v1806_v43 = vld [vmem:[#allocation5 + $0x174] sm:$0xf0]  ;;  %v2424_v47 = vld [vmem:[#allocation5 + $0x398] sm:$0xf0]  ;;  %v2201_v49 = vor.u32 %v2454_v38, %v2200_v37  ;;  %v2669_v53 = vpack.c.bf16 %v83_v41, %v83_v41 }
  0x2e   :  { %1131 = vmatpush.bf16.msra.mxu3 %v1937_v10  ;;  %v2176_v48 = vld [vmem:[#allocation5 + $0x450] sm:$0xf]  ;;  %v2448_v50 = vld [vmem:[#allocation5 + $0x458] sm:$0xf0]  ;;  %v2327_v51 = vld [vmem:[#allocation5 + $0x94] sm:$0xf]  ;;  %v1809_v55 = vor.u32 %v2354_v42, %v1806_v43  ;;  %v2081_v56 = vor.u32 %v2424_v47, %v2080_v46 }
  0x2f   :  { %1093 = vmatpush.bf16.msra.mxu0 %v1637_v16  ;;  %v1698_v52 = vld [vmem:[#allocation5 + $0x9c] sm:$0xf0]  ;;  %v81_v54 = vld [vmem:[#allocation2] sm:$0xff]  ;;  %v2351_v57 = vld [vmem:[#allocation5 + $0x154] sm:$0xf]  ;;  %v2177_v61 = vor.u32 %v2448_v50, %v2176_v48  ;;  %s2626_s15 = smov [#allocation10]  }
  0x30   :  { %1106 = vmatpush.bf16.msra.mxu1 %v1733_v19  ;;  %v1794_v58 = vld [vmem:[#allocation5 + $0x15c] sm:$0xf0]  ;;  %v2068_v59 = vld [vmem:[#allocation5 + $0x378] sm:$0xf]  ;;  %v2671_v60 = vpack.c.bf16 %v81_v54, %v81_v54  ;;  %v1701_v62 = vor.u32 %v2327_v51, %v1698_v52  ;;  %v2421_v63 = vld [vmem:[#allocation5 + $0x380] sm:$0xf0] }
  0x31   :  { %1119 = vmatpush.bf16.msra.mxu2 %v1829_v20  ;;  %v2164_v0 = vld [vmem:[#allocation5 + $0x438] sm:$0xf]  ;;  %v2445_v1 = vld [vmem:[#allocation5 + $0x440] sm:$0xf0]  ;;  %v2324_v2 = vld [vmem:[#allocation5 + $0x7c] sm:$0xf]  ;;  %v1797_v6 = vor.u32 %v2351_v57, %v1794_v58  ;;  %v2069_v7 = vor.u32 %v2421_v63, %v2068_v59 }
  0x32   :  { %1132 = vmatpush.bf16.msra.mxu3 %v1925_v24  ;;  %v1686_v3 = vld [vmem:[#allocation5 + $0x84] sm:$0xf0]  ;;  %v82_v4 = vld [vmem:[#allocation2 + $0x8] sm:$0xff]  ;;  %v2348_v8 = vld [vmem:[#allocation5 + $0x13c] sm:$0xf]  ;;  %v2165_v11 = vor.u32 %v2445_v1, %v2164_v0  ;;  %s1608_s16 = sshll.u32 %s2626_s15, 4  ;;  %s1609_s16 = int_to_ptr.vmem [resolvable:$true] %s1608_s16 }
  0x33   :  { %1094 = vmatpush.bf16.msra.mxu0 %v1625_v31  ;;  %v2675_v5 = vpack.c.bf16 %v82_v4, %v82_v4  ;;  %v1782_v9 = vld [vmem:[#allocation5 + $0x144] sm:$0xf0]  ;;  %v2056_v10 = vld [vmem:[#allocation5 + $0x360] sm:$0xf]  ;;  %v1689_v12 = vor.u32 %v2324_v2, %v1686_v3  ;;  %v2418_v13 = vld [vmem:[#allocation5 + $0x368] sm:$0xf0] }
  0x34   :  { %1107 = vmatpush.bf16.msra.mxu1 %v1721_v35  ;;  %v2152_v14 = vld [vmem:[#allocation5 + $0x420] sm:$0xf]  ;;  %v2442_v16 = vld [vmem:[#allocation5 + $0x428] sm:$0xf0]  ;;  %v2321_v17 = vld [vmem:[#allocation5 + $0x64] sm:$0xf]  ;;  %v1785_v20 = vor.u32 %v2348_v8, %v1782_v9  ;;  %v2057_v21 = vor.u32 %v2418_v13, %v2056_v10 }
  0x35   :  { %1120 = vmatpush.bf16.msra.mxu2 %v1817_v36  ;;  %v84_v15 = vld [vmem:[#allocation2 + $0x18] sm:$0xff]  ;;  %v1674_v18 = vld [vmem:[#allocation5 + $0x6c] sm:$0xf0]  ;;  %v2153_v24 = vor.u32 %v2442_v16, %v2152_v14  ;;  %v2044_v26 = vld [vmem:[#allocation5 + $0x348] sm:$0xf]  ;;  %s1610_s19 = sshll.u32 %s2723_s5, 4  ;;  %s1611_s19 = int_to_ptr.hbm [resolvable:$true] %s1610_s19 }
  0x36   :  { %1133 = vmatpush.bf16.msra.mxu3 %v1913_v39  ;;  %1095 = vmatmul.bf16.vlgmr.msra.gmra.mxu0 %v2671_v60  ;;  %v2678_v19 = vpack.c.bf16 %v84_v15, %v84_v15  ;;  %v2345_v22 = vld [vmem:[#allocation5 + $0x124] sm:$0xf]  ;;  %v1770_v23 = vld [vmem:[#allocation5 + $0x12c] sm:$0xf0]  ;;  %v1677_v25 = vor.u32 %v2321_v17, %v1674_v18  ;;  %v2415_v27 = vld [vmem:[#allocation5 + $0x350] sm:$0xf0] }
  0x37   :  { %1139 = vmatpush.bf16.msrb.mxu0 %v2093_v40  ;;  %1108 = vmatmul.bf16.vlgmr.msra.gmra.mxu1 %v2675_v5  ;;  %v2140_v28 = vld [vmem:[#allocation5 + $0x408] sm:$0xf]  ;;  %v2439_v29 = vld [vmem:[#allocation5 + $0x410] sm:$0xf0]  ;;  %v2318_v30 = vld [vmem:[#allocation5 + $0x4c] sm:$0xf]  ;;  %v1773_v32 = vor.u32 %v2345_v22, %v1770_v23  ;;  %v2045_v33 = vor.u32 %v2415_v27, %v2044_v26 }
  0x38   :  { %1152 = vmatpush.bf16.msrb.mxu1 %v2189_v44  ;;  %1121 = vmatmul.bf16.vlgmr.msra.gmra.mxu2 %v2669_v53  ;;  %v1662_v31 = vld [vmem:[#allocation5 + $0x54] sm:$0xf0]  ;;  %v2342_v34 = vld [vmem:[#allocation5 + $0x10c] sm:$0xf]  ;;  %v2141_v37 = vor.u32 %v2439_v29, %v2140_v28  ;;  %v2032_v39 = vld [vmem:[#allocation5 + $0x330] sm:$0xf] }
  0x39   :  { %1172 = vmatpush.bf16.msrb.mxu2 %v2201_v49  ;;  %1134 = vmatmul.bf16.vlgmr.msra.gmra.mxu3 %v2678_v19  ;;  %v1758_v35 = vld [vmem:[#allocation5 + $0x114] sm:$0xf0]  ;;  %v1665_v38 = vor.u32 %v2318_v30, %v1662_v31  ;;  %v2412_v40 = vld [vmem:[#allocation5 + $0x338] sm:$0xf0]  ;;  %v2128_v41 = vld [vmem:[#allocation5 + $0x3f0] sm:$0xf] }
  0x3a   :  { %1178 = vmatpush.bf16.msrb.mxu3 %v1713_v45  ;;  %v87_v36 = vld [vmem:[#allocation2 + $0x30] sm:$0xff]  ;;  %v2315_v43 = vld [vmem:[#allocation5 + $0x34] sm:$0xf]  ;;  %v1650_v44 = vld [vmem:[#allocation5 + $0x3c] sm:$0xf0]  ;;  %v1761_v46 = vor.u32 %v2342_v34, %v1758_v35  ;;  %v2033_v47 = vor.u32 %v2412_v40, %v2032_v39 }
  0x3b   :  { %1140 = vmatpush.bf16.msrb.mxu0 %v2081_v56  ;;  %v2436_v42 = vld [vmem:[#allocation5 + $0x3f8] sm:$0xf0]  ;;  %v2681_v45 = vpack.c.bf16 %v87_v36, %v87_v36  ;;  %v2339_v48 = vld [vmem:[#allocation5 + $0xf4] sm:$0xf]  ;;  %v1746_v49 = vld [vmem:[#allocation5 + $0xfc] sm:$0xf0]  ;;  %v1653_v51 = vor.u32 %v2315_v43, %v1650_v44 }
  0x3c   :  { %1153 = vmatpush.bf16.msrb.mxu1 %v2177_v61  ;;  %v2129_v50 = vor.u32 %v2436_v42, %v2128_v41  ;;  %v2020_v52 = vld [vmem:[#allocation5 + $0x318] sm:$0xf]  ;;  %v2409_v54 = vld [vmem:[#allocation5 + $0x320] sm:$0xf0]  ;;  %v2312_v57 = vld [vmem:[#allocation5 + $0x1c] sm:$0xf]  ;;  %v1749_v59 = vor.u32 %v2339_v48, %v1746_v49 }
  0x3d   :  { %1191 = vmatpush.bf16.msra.mxu2 %v1809_v55  ;;  %v2116_v55 = vld [vmem:[#allocation5 + $0x3d8] sm:$0xf]  ;;  %v2433_v56 = vld [vmem:[#allocation5 + $0x3e0] sm:$0xf0]  ;;  %v1638_v58 = vld [vmem:[#allocation5 + $0x24] sm:$0xf0]  ;;  %v2021_v61 = vor.u32 %v2409_v54, %v2020_v52 }
  0x3e   :  { %1179 = vmatpush.bf16.msrb.mxu3 %v1701_v62  ;;  %v2336_v62 = vld [vmem:[#allocation5 + $0xdc] sm:$0xf]  ;;  %v1734_v63 = vld [vmem:[#allocation5 + $0xe4] sm:$0xf0]  ;;  %v2008_v0 = vld [vmem:[#allocation5 + $0x300] sm:$0xf]  ;;  %v2117_v1 = vor.u32 %v2433_v56, %v2116_v55  ;;  %v1641_v2 = vor.u32 %v2312_v57, %v1638_v58 }
  0x3f   :  { %1141 = vmatpush.bf16.msrb.mxu0 %v2069_v7  ;;  %v2406_v3 = vld [vmem:[#allocation5 + $0x308] sm:$0xf0]  ;;  %v2104_v4 = vld [vmem:[#allocation5 + $0x3c0] sm:$0xf]  ;;  %v2309_v7 = vld [vmem:[#allocation5 + $0x4] sm:$0xf]  ;;  %v1737_v13 = vor.u32 %v2336_v62, %v1734_v63 }
  0x40   :  { %1154 = vmatpush.bf16.msrb.mxu1 %v2165_v11  ;;  %v1626_v8 = vld [vmem:[#allocation5 + $0xc] sm:$0xf0]  ;;  %v2378_v9 = vld [vmem:[#allocation5 + $0x22c] sm:$0xf]  ;;  %v1902_v10 = vld [vmem:[#allocation5 + $0x234] sm:$0xf0]  ;;  %v2009_v14 = vor.u32 %v2406_v3, %v2008_v0 }
  0x41   :  { %1192 = vmatpush.bf16.msra.mxu2 %v1797_v6  ;;  %v2430_v6 = vld [vmem:[#allocation5 + $0x3c8] sm:$0xf0]  ;;  %v2094_v16 = vld [vmem:[#allocation5 + $0x3b4] sm:$0xf0]  ;;  %v1722_v22 = vld [vmem:[#allocation5 + $0xcc] sm:$0xf0] }
  0x42   :  { %1180 = vmatpush.bf16.msrb.mxu3 %v1689_v12  ;;  %v2402_v11 = vld [vmem:[#allocation5 + $0x2ec] sm:$0xf]  ;;  %v1998_v12 = vld [vmem:[#allocation5 + $0x2f4] sm:$0xf0]  ;;  %v2105_v18 = vor.u32 %v2430_v6, %v2104_v4  ;;  %v86_v23 = vld [vmem:[#allocation2 + $0x28] sm:$0xff] }
  0x43   :  { %1142 = vmatpush.bf16.msrb.mxu0 %v2057_v21  ;;  %v2426_v15 = vld [vmem:[#allocation5 + $0x3ac] sm:$0xf]  ;;  %v2333_v21 = vld [vmem:[#allocation5 + $0xc4] sm:$0xf]  ;;  %v2190_v27 = vld [vmem:[#allocation5 + $0x474] sm:$0xf0]  ;;  %v2687_v35 = vpack.c.bf16 %v86_v23, %v86_v23 }
  0x44   :  { %1155 = vmatpush.bf16.msrb.mxu1 %v2153_v24  ;;  %v85_v17 = vld [vmem:[#allocation2 + $0x20] sm:$0xff]  ;;  %v1905_v24 = vor.u32 %v2378_v9, %v1902_v10  ;;  %v2375_v28 = vld [vmem:[#allocation5 + $0x214] sm:$0xf]  ;;  %v2097_v29 = vor.u32 %v2426_v15, %v2094_v16  ;;  %v1890_v31 = vld [vmem:[#allocation5 + $0x21c] sm:$0xf0]  ;;  %v1725_v34 = vor.u32 %v2333_v21, %v1722_v22 }
  0x45   :  { %1193 = vmatpush.bf16.msra.mxu2 %v1785_v20  ;;  %v1629_v20 = vor.u32 %v2309_v7, %v1626_v8  ;;  %v2450_v26 = vld [vmem:[#allocation5 + $0x46c] sm:$0xf]  ;;  %v2685_v30 = vpack.c.bf16 %v85_v17, %v85_v17  ;;  %v2423_v36 = vld [vmem:[#allocation5 + $0x394] sm:$0xf]  ;;  %v1893_v39 = vor.u32 %v2375_v28, %v1890_v31  ;;  %v2178_v42 = vld [vmem:[#allocation5 + $0x45c] sm:$0xf0] }
  0x46   :  { %1181 = vmatpush.bf16.msrb.mxu3 %v1677_v25  ;;  %v2001_v25 = vor.u32 %v2402_v11, %v1998_v12  ;;  %v2447_v41 = vld [vmem:[#allocation5 + $0x454] sm:$0xf]  ;;  %v2372_v43 = vld [vmem:[#allocation5 + $0x1fc] sm:$0xf]  ;;  %v1974_v48 = vld [vmem:[#allocation5 + $0x2c4] sm:$0xf0] }
  0x47   :  { %1143 = vmatpush.bf16.msrb.mxu0 %v2045_v33  ;;  %v1986_v33 = vld [vmem:[#allocation5 + $0x2dc] sm:$0xf0]  ;;  %v2420_v49 = vld [vmem:[#allocation5 + $0x37c] sm:$0xf]  ;;  %v2166_v56 = vld [vmem:[#allocation5 + $0x444] sm:$0xf0] }
  0x48   :  { %1156 = vmatpush.bf16.msrb.mxu1 %v2141_v37  ;;  %2210 = vmatmul.msk.bf16.vlgmr.msrb.gmra.mxu2 %vm1083_vm0, %v2681_v45  ;;  %v2082_v37 = vld [vmem:[#allocation5 + $0x39c] sm:$0xf0]  ;;  %v2444_v55 = vld [vmem:[#allocation5 + $0x43c] sm:$0xf]  ;;  %v2369_v57 = vld [vmem:[#allocation5 + $0x1e4] sm:$0xf] }
  0x49   :  { %1194 = vmatpush.bf16.msra.mxu2 %v1773_v32  ;;  %v2399_v32 = vld [vmem:[#allocation5 + $0x2d4] sm:$0xf]  ;;  %v2085_v44 = vor.u32 %v2423_v36, %v2082_v37  ;;  %v1962_v62 = vld [vmem:[#allocation5 + $0x2ac] sm:$0xf0]  ;;  %v2417_v63 = vld [vmem:[#allocation5 + $0x364] sm:$0xf] }
  0x4a   :  { %1182 = vmatpush.bf16.msrb.mxu3 %v1665_v38  ;;  %v2193_v38 = vor.u32 %v2450_v26, %v2190_v27  ;;  %v1989_v40 = vor.u32 %v2399_v32, %v1986_v33  ;;  %v2058_v0 = vld [vmem:[#allocation5 + $0x36c] sm:$0xf0]  ;;  %v2441_v4 = vld [vmem:[#allocation5 + $0x424] sm:$0xf]  ;;  %v2366_v7 = vld [vmem:[#allocation5 + $0x1cc] sm:$0xf] }
  0x4b   :  { %1144 = vmatpush.bf16.msrb.mxu0 %v2033_v47  ;;  %v2396_v47 = vld [vmem:[#allocation5 + $0x2bc] sm:$0xf]  ;;  %v2154_v6 = vld [vmem:[#allocation5 + $0x42c] sm:$0xf0]  ;;  %v2061_v8 = vor.u32 %v2417_v63, %v2058_v0  ;;  %v1854_v9 = vld [vmem:[#allocation5 + $0x1d4] sm:$0xf0] }
  0x4c   :  { %1157 = vmatpush.bf16.msrb.mxu1 %v2129_v50  ;;  %v2070_v50 = vld [vmem:[#allocation5 + $0x384] sm:$0xf0]  ;;  %v1977_v54 = vor.u32 %v2396_v47, %v1974_v48  ;;  %v2390_v10 = vld [vmem:[#allocation5 + $0x28c] sm:$0xf]  ;;  %v1950_v11 = vld [vmem:[#allocation5 + $0x294] sm:$0xf0]  ;;  %v1857_v15 = vor.u32 %v2366_v7, %v1854_v9 }
  0x4d   :  { %1195 = vmatpush.bf16.msra.mxu2 %v1761_v46  ;;  %v1878_v46 = vld [vmem:[#allocation5 + $0x204] sm:$0xf0]  ;;  %v2073_v58 = vor.u32 %v2420_v49, %v2070_v50  ;;  %v2414_v12 = vld [vmem:[#allocation5 + $0x34c] sm:$0xf]  ;;  %v1953_v16 = vor.u32 %v2390_v10, %v1950_v11  ;;  %v1842_v22 = vld [vmem:[#allocation5 + $0x1bc] sm:$0xf0] }
  0x4e   :  { %1183 = vmatpush.bf16.msrb.mxu3 %v1653_v51  ;;  %v2181_v51 = vor.u32 %v2447_v41, %v2178_v42  ;;  %v1881_v52 = vor.u32 %v2372_v43, %v1878_v46  ;;  %v2438_v17 = vld [vmem:[#allocation5 + $0x40c] sm:$0xf]  ;;  %v2387_v23 = vld [vmem:[#allocation5 + $0x274] sm:$0xf]  ;;  %v2034_v26 = vld [vmem:[#allocation5 + $0x33c] sm:$0xf0] }
  0x4f   :  { %1145 = vmatpush.bf16.msrb.mxu0 %v2021_v61  ;;  %v2393_v61 = vld [vmem:[#allocation5 + $0x2a4] sm:$0xf]  ;;  %v2435_v31 = vld [vmem:[#allocation5 + $0x3f4] sm:$0xf]  ;;  %v2130_v32 = vld [vmem:[#allocation5 + $0x3fc] sm:$0xf0] }
  0x50   :  { %1158 = vmatpush.bf16.msrb.mxu1 %v2117_v1  ;;  %v2169_v1 = vor.u32 %v2444_v55, %v2166_v56  ;;  %v1965_v3 = vor.u32 %v2393_v61, %v1962_v62  ;;  %v2360_v33 = vld [vmem:[#allocation5 + $0x19c] sm:$0xf]  ;;  %v1830_v36 = vld [vmem:[#allocation5 + $0x1a4] sm:$0xf0]  ;;  %v2133_v41 = vor.u32 %v2435_v31, %v2130_v32  ;;  %v2357_v47 = vld [vmem:[#allocation5 + $0x184] sm:$0xf] }
  0x51   :  { %1196 = vmatpush.bf16.msra.mxu2 %v1749_v59  ;;  %v1866_v59 = vld [vmem:[#allocation5 + $0x1ec] sm:$0xf0]  ;;  %v2384_v37 = vld [vmem:[#allocation5 + $0x25c] sm:$0xf]  ;;  %v2118_v43 = vld [vmem:[#allocation5 + $0x3e4] sm:$0xf0] }
  0x52   :  { %1184 = vmatpush.bf16.msrb.mxu3 %v1641_v2  ;;  %v1869_v2 = vor.u32 %v2369_v57, %v1866_v59  ;;  %v2432_v42 = vld [vmem:[#allocation5 + $0x3dc] sm:$0xf]  ;;  %v1818_v48 = vld [vmem:[#allocation5 + $0x18c] sm:$0xf0]  ;;  %v2381_v49 = vld [vmem:[#allocation5 + $0x244] sm:$0xf] }
  0x53   :  { %1146 = vmatpush.bf16.msrb.mxu0 %v2009_v14  ;;  %v2157_v14 = vor.u32 %v2441_v4, %v2154_v6  ;;  %v1716_v55 = vld [vmem:[#allocation5 + $0xb0] sm:$0xf]  ;;  %v2332_v56 = vld [vmem:[#allocation5 + $0xb8] sm:$0xf0]  ;;  %v2453_v57 = vld [vmem:[#allocation5 + $0x484] sm:$0xf]  ;;  %v1821_v63 = vor.u32 %v2357_v47, %v1818_v48 }
  0x54   :  { %1159 = vmatpush.bf16.msrb.mxu1 %v2105_v18  ;;  %v2142_v18 = vld [vmem:[#allocation5 + $0x414] sm:$0xf0]  ;;  %v2202_v59 = vld [vmem:[#allocation5 + $0x48c] sm:$0xf0]  ;;  %v2380_v62 = vld [vmem:[#allocation5 + $0x238] sm:$0xf0]  ;;  %v1717_v4 = vor.u32 %v2332_v56, %v1716_v55 }
  0x55   :  { %1197 = vmatpush.bf16.msra.mxu2 %v1737_v13  ;;  %v2046_v13 = vld [vmem:[#allocation5 + $0x354] sm:$0xf0]  ;;  %v2145_v27 = vor.u32 %v2438_v17, %v2142_v18  ;;  %v1908_v61 = vld [vmem:[#allocation5 + $0x230] sm:$0xf]  ;;  %v2205_v7 = vor.u32 %v2453_v57, %v2202_v59  ;;  %v2329_v10 = vld [vmem:[#allocation5 + $0xa0] sm:$0xf0] }
  0x56   :  { %1185 = vmatpush.bf16.msrb.mxu3 %v1629_v20  ;;  %1147 = vmatmul.bf16.vlgmr.msrb.gmra.mxu0 %v2685_v30  ;;  %v2363_v20 = vld [vmem:[#allocation5 + $0x1b4] sm:$0xf]  ;;  %v2049_v21 = vor.u32 %v2414_v12, %v2046_v13  ;;  %v1812_v6 = vld [vmem:[#allocation5 + $0x170] sm:$0xf]  ;;  %v1704_v9 = vld [vmem:[#allocation5 + $0x98] sm:$0xf]  ;;  %v1909_v11 = vor.u32 %v2380_v62, %v1908_v61 }
  0x57   :  { %1204 = vmatpush.bf16.msra.mxu0 %v1905_v24  ;;  %1160 = vmatmul.bf16.vlgmr.msrb.gmra.mxu1 %v2687_v35  ;;  %v1938_v24 = vld [vmem:[#allocation5 + $0x27c] sm:$0xf0]  ;;  %v1845_v28 = vor.u32 %v2363_v20, %v1842_v22  ;;  %v1896_v13 = vld [vmem:[#allocation5 + $0x218] sm:$0xf]  ;;  %v1705_v18 = vor.u32 %v2329_v10, %v1704_v9  ;;  %v1776_v47 = vld [vmem:[#allocation5 + $0x128] sm:$0xf] }
  0x58   :  { %1217 = vmatpush.bf16.msra.mxu1 %v2001_v25  ;;  %v2411_v25 = vld [vmem:[#allocation5 + $0x334] sm:$0xf]  ;;  %v1800_v20 = vld [vmem:[#allocation5 + $0x158] sm:$0xf]  ;;  %v1692_v22 = vld [vmem:[#allocation5 + $0x80] sm:$0xf] }
  0x59   :  { %1198 = vmatpush.bf16.msra.mxu2 %v1725_v34  ;;  %1186 = vmatmul.bf16.vlgmr.msrb.gmra.mxu3 %v2671_v60  ;;  %v2037_v34 = vor.u32 %v2411_v25, %v2034_v26  ;;  %v1884_v26 = vld [vmem:[#allocation5 + $0x200] sm:$0xf]  ;;  %v2347_v48 = vld [vmem:[#allocation5 + $0x130] sm:$0xf0]  ;;  %v2368_v55 = vld [vmem:[#allocation5 + $0x1d8] sm:$0xf0] }
  0x5a   :  { %1230 = vmatpush.bf16.msra.mxu3 %v2097_v29  ;;  %v1941_v29 = vor.u32 %v2387_v23, %v1938_v24  ;;  %v2326_v23 = vld [vmem:[#allocation5 + $0x88] sm:$0xf0]  ;;  %v1968_v56 = vld [vmem:[#allocation5 + $0x2a8] sm:$0xf]  ;;  %v2395_v57 = vld [vmem:[#allocation5 + $0x2b0] sm:$0xf0] }
  0x5b   :  { %1205 = vmatpush.bf16.msra.mxu0 %v1893_v39  ;;  %v2408_v39 = vld [vmem:[#allocation5 + $0x31c] sm:$0xf]  ;;  %v1693_v32 = vor.u32 %v2326_v23, %v1692_v22  ;;  %v1764_v61 = vld [vmem:[#allocation5 + $0x110] sm:$0xf]  ;;  %v1752_v10 = vld [vmem:[#allocation5 + $0xf8] sm:$0xf] }
  0x5c   :  { %1218 = vmatpush.bf16.msra.mxu1 %v1989_v40  ;;  %1199 = vmatmul.bf16.vlgmr.msra.gmra.mxu2 %v2675_v5  ;;  %v2022_v40 = vld [vmem:[#allocation5 + $0x324] sm:$0xf0]  ;;  %v2344_v62 = vld [vmem:[#allocation5 + $0x118] sm:$0xf0]  ;;  %v1740_v23 = vld [vmem:[#allocation5 + $0xe0] sm:$0xf] }
  0x5d   :  { %1243 = vmatpush.bf16.msrb.mxu2 %v2193_v38  ;;  %v1926_v38 = vld [vmem:[#allocation5 + $0x264] sm:$0xf0]  ;;  %v2025_v50 = vor.u32 %v2408_v39, %v2022_v40 }
  0x5e   :  { %1231 = vmatpush.bf16.msra.mxu3 %v2085_v44  ;;  %v1833_v44 = vor.u32 %v2360_v33, %v1830_v36  ;;  %v1929_v46 = vor.u32 %v2384_v37, %v1926_v38  ;;  %v1788_v33 = vld [vmem:[#allocation5 + $0x140] sm:$0xf]  ;;  %v1680_v36 = vld [vmem:[#allocation5 + $0x68] sm:$0xf]  ;;  %v2323_v37 = vld [vmem:[#allocation5 + $0x70] sm:$0xf0] }
  0x5f   :  { %1206 = vmatpush.bf16.msra.mxu0 %v1881_v52  ;;  %v2405_v52 = vld [vmem:[#allocation5 + $0x304] sm:$0xf]  ;;  %v1872_v40 = vld [vmem:[#allocation5 + $0x1e8] sm:$0xf] }
  0x60   :  { %1219 = vmatpush.bf16.msra.mxu1 %v1977_v54  ;;  %v2010_v54 = vld [vmem:[#allocation5 + $0x30c] sm:$0xf0] }
  0x61   :  { %1244 = vmatpush.bf16.msrb.mxu2 %v2181_v51  ;;  %v1914_v51 = vld [vmem:[#allocation5 + $0x24c] sm:$0xf0] }
  0x62   :  { %1232 = vmatpush.bf16.msra.mxu3 %v2073_v58  ;;  %v2121_v58 = vor.u32 %v2432_v42, %v2118_v43  ;;  %v1917_v0 = vor.u32 %v2381_v49, %v1914_v51  ;;  %v1980_v42 = vld [vmem:[#allocation5 + $0x2c0] sm:$0xf]  ;;  %v2398_v43 = vld [vmem:[#allocation5 + $0x2c8] sm:$0xf0]  ;;  %v1668_v49 = vld [vmem:[#allocation5 + $0x50] sm:$0xf] }
  0x63   :  { %1207 = vmatpush.bf16.msra.mxu0 %v1869_v2  ;;  %v2106_v2 = vld [vmem:[#allocation5 + $0x3cc] sm:$0xf0] }
  0x64   :  { %1220 = vmatpush.bf16.msra.mxu1 %v1965_v3  ;;  %v2013_v3 = vor.u32 %v2405_v52, %v2010_v54  ;;  %v1981_v52 = vor.u32 %v2398_v43, %v1980_v42  ;;  %v1860_v54 = vld [vmem:[#allocation5 + $0x1d0] sm:$0xf]  ;;  %v1728_v42 = vld [vmem:[#allocation5 + $0xc8] sm:$0xf]  ;;  %v2335_v43 = vld [vmem:[#allocation5 + $0xd0] sm:$0xf0] }
  0x65   :  { %1245 = vmatpush.bf16.msrb.mxu2 %v2169_v1  ;;  %v2429_v1 = vld [vmem:[#allocation5 + $0x3c4] sm:$0xf] }
  0x66   :  { %1233 = vmatpush.bf16.msra.mxu3 %v2061_v8  ;;  %v2356_v8 = vld [vmem:[#allocation5 + $0x178] sm:$0xf0]  ;;  %v2109_v12 = vor.u32 %v2429_v1, %v2106_v2  ;;  %v1861_v1 = vor.u32 %v2368_v55, %v1860_v54  ;;  %v1969_v2 = vor.u32 %v2395_v57, %v1968_v56  ;;  %v2383_v54 = vld [vmem:[#allocation5 + $0x250] sm:$0xf0]  ;;  %v1729_v55 = vor.u32 %v2335_v43, %v1728_v42 }
  0x67   :  { %1208 = vmatpush.bf16.msra.mxu0 %v1857_v15  ;;  %v2004_v15 = vld [vmem:[#allocation5 + $0x2f0] sm:$0xf]  ;;  %v1813_v17 = vor.u32 %v2356_v8, %v1812_v6  ;;  %v1765_v8 = vor.u32 %v2344_v62, %v1764_v61  ;;  %v2076_v61 = vld [vmem:[#allocation5 + $0x380] sm:$0xf]  ;;  %v2422_v62 = vld [vmem:[#allocation5 + $0x388] sm:$0xf0] }
  0x68   :  { %1221 = vmatpush.bf16.msra.mxu1 %v1953_v16  ;;  %v2404_v16 = vld [vmem:[#allocation5 + $0x2f8] sm:$0xf0]  ;;  %v1956_v6 = vld [vmem:[#allocation5 + $0x290] sm:$0xf] }
  0x69   :  { %1246 = vmatpush.bf16.msrb.mxu2 %v2157_v14  ;;  %v2377_v14 = vld [vmem:[#allocation5 + $0x220] sm:$0xf0]  ;;  %v2005_v25 = vor.u32 %v2404_v16, %v2004_v15  ;;  %v1836_v16 = vld [vmem:[#allocation5 + $0x1a0] sm:$0xf] }
  0x6a   :  { %1234 = vmatpush.bf16.msra.mxu3 %v2049_v21  ;;  %v2353_v21 = vld [vmem:[#allocation5 + $0x160] sm:$0xf0]  ;;  %v1897_v24 = vor.u32 %v2377_v14, %v1896_v13  ;;  %v2314_v13 = vld [vmem:[#allocation5 + $0x28] sm:$0xf0]  ;;  %v2456_v43 = vld [vmem:[#allocation8] sm:$0xff] }
  0x6b   :  { %1209 = vmatpush.bf16.msra.mxu0 %v1845_v28  ;;  %v1992_v28 = vld [vmem:[#allocation5 + $0x2d8] sm:$0xf]  ;;  %v1801_v31 = vor.u32 %v2353_v21, %v1800_v20  ;;  %v2389_v20 = vld [vmem:[#allocation5 + $0x280] sm:$0xf0] }
  0x6c   :  { %1222 = vmatpush.bf16.msra.mxu1 %v1941_v29  ;;  %v2401_v29 = vld [vmem:[#allocation5 + $0x2e0] sm:$0xf0] }
  0x6d   :  { %1247 = vmatpush.bf16.msrb.mxu2 %v2145_v27  ;;  %v2374_v27 = vld [vmem:[#allocation5 + $0x208] sm:$0xf0]  ;;  %v1993_v39 = vor.u32 %v2401_v29, %v1992_v28  ;;  %v2428_v28 = vld [vmem:[#allocation5 + $0x3b8] sm:$0xf0] }
  0x6e   :  { %1235 = vmatpush.bf16.msra.mxu3 %v2037_v34  ;;  %v2350_v34 = vld [vmem:[#allocation5 + $0x148] sm:$0xf0]  ;;  %v1885_v38 = vor.u32 %v2374_v27, %v1884_v26  ;;  %v2311_v26 = vld [vmem:[#allocation5 + $0x10] sm:$0xf0]  ;;  %v2100_v27 = vld [vmem:[#allocation5 + $0x3b0] sm:$0xf] }
  0x6f   :  { %1210 = vmatpush.bf16.msra.mxu0 %v1833_v44  ;;  %v1789_v44 = vor.u32 %v2350_v34, %v1788_v33  ;;  %v2359_v33 = vld [vmem:[#allocation5 + $0x190] sm:$0xf0]  ;;  %v1932_v34 = vld [vmem:[#allocation5 + $0x260] sm:$0xf] }
  0x70   :  { %1223 = vmatpush.bf16.msra.mxu1 %v1929_v46  ;;  %v1681_v46 = vor.u32 %v2323_v37, %v1680_v36  ;;  %v2386_v36 = vld [vmem:[#allocation5 + $0x268] sm:$0xf0]  ;;  %v2208_v37 = vld [vmem:[#allocation5 + $0x488] sm:$0xf] }
  0x71   :  { %1248 = vmatpush.bf16.msrb.mxu2 %v2133_v41  ;;  %v2371_v41 = vld [vmem:[#allocation5 + $0x1f0] sm:$0xf0] }
  0x72   :  { %1236 = vmatpush.bf16.msra.mxu3 %v2025_v50  ;;  %v2320_v50 = vld [vmem:[#allocation5 + $0x58] sm:$0xf0]  ;;  %v1873_v51 = vor.u32 %v2371_v41, %v1872_v40  ;;  %v2101_v41 = vor.u32 %v2428_v28, %v2100_v27  ;;  %v2124_v28 = vld [vmem:[#allocation5 + $0x3e0] sm:$0xf] }
  0x73   :  { %1211 = vmatpush.bf16.msra.mxu0 %v1821_v63  ;;  %v1669_v59 = vor.u32 %v2320_v50, %v1668_v49  ;;  %v1656_v63 = vld [vmem:[#allocation5 + $0x38] sm:$0xf]  ;;  %v2425_v49 = vld [vmem:[#allocation5 + $0x3a0] sm:$0xf0]  ;;  %v1933_v50 = vor.u32 %v2386_v36, %v1932_v34 }
  0x74   :  { %1224 = vmatpush.bf16.msra.mxu1 %v1917_v0  ;;  %v2317_v0 = vld [vmem:[#allocation5 + $0x40] sm:$0xf0] }
  0x75   :  { %1249 = vmatpush.bf16.msrb.mxu2 %v2121_v58  ;;  %v1777_v58 = vor.u32 %v2347_v48, %v1776_v47  ;;  %v1657_v9 = vor.u32 %v2317_v0, %v1656_v63  ;;  %v2452_v47 = vld [vmem:[#allocation5 + $0x478] sm:$0xf0]  ;;  %v2088_v48 = vld [vmem:[#allocation5 + $0x398] sm:$0xf] }
  0x76   :  { %1237 = vmatpush.bf16.msra.mxu3 %v2013_v3  ;;  %1212 = vmatmul.bf16.vlgmr.msra.gmra.mxu0 %v2669_v53  ;;  %v1848_v3 = vld [vmem:[#allocation5 + $0x1b8] sm:$0xf]  ;;  %v2089_v57 = vor.u32 %v2425_v49, %v2088_v48 }
  0x77   :  { %1295 = vmatpush.bf16.msrb.mxu0 %v1909_v11  ;;  %1225 = vmatmul.bf16.vlgmr.msra.gmra.mxu1 %v2678_v19  ;;  %v2341_v11 = vld [vmem:[#allocation5 + $0x100] sm:$0xf0]  ;;  %v2463_v0 = vld [vmem:[#allocation8 + $0x38] sm:$0xff] }
  0x78   :  { %1269 = vmatpush.bf16.msrb.mxu1 %v1717_v4  ;;  %v2365_v4 = vld [vmem:[#allocation5 + $0x1c0] sm:$0xf0]  ;;  %v1753_v21 = vor.u32 %v2341_v11, %v1752_v10  ;;  %v2462_v10 = vld [vmem:[#allocation8 + $0x30] sm:$0xff] }
  0x79   :  { %1250 = vmatpush.bf16.msrb.mxu2 %v2109_v12  ;;  %1238 = vmatmul.bf16.vlgmr.msra.gmra.mxu3 %v2685_v30  ;;  %v1644_v12 = vld [vmem:[#allocation5 + $0x20] sm:$0xf]  ;;  %v1849_v14 = vor.u32 %v2365_v4, %v1848_v3  ;;  %v2446_v4 = vld [vmem:[#allocation5 + $0x448] sm:$0xf0]  ;;  %v2052_v11 = vld [vmem:[#allocation5 + $0x350] sm:$0xf] }
  0x7a   :  { %1263 = vmatpush.bf16.msrb.mxu3 %v2205_v7  ;;  %v2392_v7 = vld [vmem:[#allocation5 + $0x298] sm:$0xf0]  ;;  %v1645_v22 = vor.u32 %v2314_v13, %v1644_v12  ;;  %v2172_v3 = vld [vmem:[#allocation5 + $0x440] sm:$0xf] }
  0x7b   :  { %1296 = vmatpush.bf16.msrb.mxu0 %v1897_v24  ;;  %v1957_v15 = vor.u32 %v2392_v7, %v1956_v6  ;;  %v2338_v24 = vld [vmem:[#allocation5 + $0xe8] sm:$0xf0]  ;;  %v2064_v6 = vld [vmem:[#allocation5 + $0x368] sm:$0xf]  ;;  %v2419_v7 = vld [vmem:[#allocation5 + $0x370] sm:$0xf0] }
  0x7c   :  { %1270 = vmatpush.bf16.msrb.mxu1 %v1705_v18  ;;  %1251 = vmatmul.bf16.vlgmr.msrb.gmra.mxu2 %v2687_v35  ;;  %v1944_v18 = vld [vmem:[#allocation5 + $0x278] sm:$0xf]  ;;  %v2416_v12 = vld [vmem:[#allocation5 + $0x358] sm:$0xf0] }
  0x7d   :  { %1308 = vmatpush.bf16.msra.mxu2 %v2005_v25  ;;  %v1632_v25 = vld [vmem:[#allocation5 + $0x8] sm:$0xf] }
  0x7e   :  { %1282 = vmatpush.bf16.msra.mxu3 %v1813_v17  ;;  %v2362_v17 = vld [vmem:[#allocation5 + $0x1a8] sm:$0xf0]  ;;  %v1633_v40 = vor.u32 %v2311_v26, %v1632_v25 }
  0x7f   :  { %1297 = vmatpush.bf16.msrb.mxu0 %v1885_v38  ;;  %v1837_v29 = vor.u32 %v2362_v17, %v1836_v16  ;;  %v2455_v38 = vld [vmem:[#allocation5 + $0x490] sm:$0xf0]  ;;  %v2440_v16 = vld [vmem:[#allocation5 + $0x418] sm:$0xf0]  ;;  %v2413_v17 = vld [vmem:[#allocation5 + $0x340] sm:$0xf0] }
  0x80   :  { %1271 = vmatpush.bf16.msrb.mxu1 %v1693_v32  ;;  %v1824_v32 = vld [vmem:[#allocation5 + $0x188] sm:$0xf]  ;;  %v2410_v25 = vld [vmem:[#allocation5 + $0x328] sm:$0xf0] }
  0x81   :  { %1309 = vmatpush.bf16.msra.mxu2 %v1993_v39  ;;  %v1741_v39 = vor.u32 %v2338_v24, %v1740_v23  ;;  %v2437_v23 = vld [vmem:[#allocation5 + $0x400] sm:$0xf0]  ;;  %v2028_v24 = vld [vmem:[#allocation5 + $0x320] sm:$0xf] }
  0x82   :  { %1283 = vmatpush.bf16.msra.mxu3 %v1801_v31  ;;  %v1945_v31 = vor.u32 %v2389_v20, %v1944_v18  ;;  %v2461_v18 = vld [vmem:[#allocation8 + $0x28] sm:$0xff]  ;;  %v2029_v27 = vor.u32 %v2410_v25, %v2028_v24  ;;  %v2479_v24 = vld [vmem:[#allocation8 + $0xb8] sm:$0xff] }
  0x83   :  { %1298 = vmatpush.bf16.msrb.mxu0 %v1873_v51  ;;  %v2209_v51 = vor.u32 %v2455_v38, %v2208_v37  ;;  %v2112_v37 = vld [vmem:[#allocation5 + $0x3c8] sm:$0xf]  ;;  %v2431_v38 = vld [vmem:[#allocation5 + $0x3d0] sm:$0xf0] }
  0x84   :  { %1272 = vmatpush.bf16.msrb.mxu1 %v1681_v46  ;;  %v1825_v46 = vor.u32 %v2359_v33, %v1824_v32  ;;  %v2407_v32 = vld [vmem:[#allocation5 + $0x310] sm:$0xf0] }
  0x85   :  { %1310 = vmatpush.bf16.msra.mxu2 %v1981_v52  ;;  %v1920_v52 = vld [vmem:[#allocation5 + $0x248] sm:$0xf]  ;;  %v2459_v33 = vld [vmem:[#allocation8 + $0x18] sm:$0xff] }
  0x86   :  { %1284 = vmatpush.bf16.msra.mxu3 %v1789_v44  ;;  %v2196_v44 = vld [vmem:[#allocation5 + $0x470] sm:$0xf]  ;;  %v1921_v63 = vor.u32 %v2383_v54, %v1920_v52 }
  0x87   :  { %1299 = vmatpush.bf16.msrb.mxu0 %v1861_v1  ;;  %v2197_v56 = vor.u32 %v2452_v47, %v2196_v44  ;;  %v2707_v44 = vld [vmem:[#allocation7] sm:$0x7] }
  0x88   :  { %1273 = vmatpush.bf16.msrb.mxu1 %v1669_v59  ;;  %v2449_v59 = vld [vmem:[#allocation5 + $0x460] sm:$0xf0]  ;;  %v293_v48 = vperm.slane %v2707_v44, 0 }
  0x89   :  { %1311 = vmatpush.bf16.msra.mxu2 %v1969_v2  ;;  %2211 = vmatmul.msk.bf16.vlgmr.msrb.gmra.mxu3 %vm1083_vm0, %v2681_v45  ;;  %v2077_v2 = vor.u32 %v2422_v62, %v2076_v61 }
  0x8a   :  { %1285 = vmatpush.bf16.msra.mxu3 %v1777_v58  ;;  %v2184_v58 = vld [vmem:[#allocation5 + $0x458] sm:$0xf] }
  0x8b   :  { %1300 = vmatpush.bf16.msrb.mxu0 %v1849_v14  ;;  %v2185_v1 = vor.u32 %v2449_v59, %v2184_v58  ;;  %v2053_v14 = vor.u32 %v2416_v12, %v2052_v11  ;;  %v2470_v58 = vld [vmem:[#allocation8 + $0x70] sm:$0xff] }
  0x8c   :  { %1274 = vmatpush.bf16.msrb.mxu1 %v1657_v9  ;;  %v2160_v9 = vld [vmem:[#allocation5 + $0x428] sm:$0xf] }
  0x8d   :  { %1312 = vmatpush.bf16.msra.mxu2 %v1957_v15  ;;  %v2148_v15 = vld [vmem:[#allocation5 + $0x410] sm:$0xf] }
  0x8e   :  { %1286 = vmatpush.bf16.msra.mxu3 %v1765_v8  ;;  %v2173_v8 = vor.u32 %v2446_v4, %v2172_v3  ;;  %v2149_v20 = vor.u32 %v2440_v16, %v2148_v15  ;;  %v2468_v4 = vld [vmem:[#allocation8 + $0x60] sm:$0xff] }
  0x8f   :  { %1301 = vmatpush.bf16.msrb.mxu0 %v1837_v29  ;;  %v2434_v29 = vld [vmem:[#allocation5 + $0x3e8] sm:$0xf0] }
  0x90   :  { %1275 = vmatpush.bf16.msrb.mxu1 %v1645_v22  ;;  %v2136_v22 = vld [vmem:[#allocation5 + $0x3f8] sm:$0xf]  ;;  %v2125_v34 = vor.u32 %v2434_v29, %v2124_v28  ;;  %v2477_v28 = vld [vmem:[#allocation8 + $0xa8] sm:$0xff] }
  0x91   :  { %1313 = vmatpush.bf16.msra.mxu2 %v1945_v31  ;;  %v2137_v26 = vor.u32 %v2437_v23, %v2136_v22  ;;  %v2016_v31 = vld [vmem:[#allocation5 + $0x308] sm:$0xf] }
  0x92   :  { %1287 = vmatpush.bf16.msra.mxu3 %v1753_v21  ;;  %v2017_v36 = vor.u32 %v2407_v32, %v2016_v31  ;;  %v2476_v32 = vld [vmem:[#allocation8 + $0xa0] sm:$0xff] }
  0x93   :  { %1302 = vmatpush.bf16.msrb.mxu0 %v1825_v46 }
  0x94   :  { %1276 = vmatpush.bf16.msrb.mxu1 %v1633_v40 }
  0x95   :  { %1314 = vmatpush.bf16.msra.mxu2 %v1933_v50  ;;  %v2471_v50 = vld [vmem:[#allocation8 + $0x78] sm:$0xff] }
  0x96   :  { %1288 = vmatpush.bf16.msra.mxu3 %v1741_v39  ;;  %1303 = vmatmul.bf16.vlgmr.msrb.gmra.mxu0 %v2669_v53  ;;  %v2443_v53 = vld [vmem:[#allocation5 + $0x430] sm:$0xf0]  ;;  %v2458_v39 = vld [vmem:[#allocation8 + $0x10] sm:$0xff] }
  0x97   :  { %1354 = vmatpush.bf16.msra.mxu0 %v2209_v51  ;;  %1277 = vmatmul.bf16.vlgmr.msrb.gmra.mxu1 %v2671_v60  ;;  %v2065_v60 = vor.u32 %v2419_v7, %v2064_v6  ;;  %v2161_v13 = vor.u32 %v2443_v53, %v2160_v9  ;;  %v2466_v53 = vld [vmem:[#allocation8 + $0x50] sm:$0xff] }
  0x98   :  { %1321 = vmatpush.bf16.msra.mxu1 %v2101_v41  ;;  %v2457_v41 = vld [vmem:[#allocation8 + $0x8] sm:$0xff] }
  0x99   :  { %1315 = vmatpush.bf16.msra.mxu2 %v1921_v63 }
  0x9a   :  { %1289 = vmatpush.bf16.msra.mxu3 %v1729_v55 }
  0x9b   :  { %1575 = vmatpush.bf16.msrb.mxu0 %v2471_v50 }
  0x9c   :  { %1322 = vmatpush.bf16.msra.mxu1 %v2089_v57  ;;  %1316 = vmatmul.bf16.vlgmr.msra.gmra.mxu2 %v2678_v19  ;;  %v2460_v19 = vld [vmem:[#allocation8 + $0x20] sm:$0xff] }
  0x9d   :  { %1290 = vmatmul.bf16.vlgmr.msra.gmra.mxu3 %v2675_v5  ;;  %1562 = vmatpush.bf16.msrb.mxu2 %v2463_v0  ;;  %v2040_v5 = vld [vmem:[#allocation5 + $0x338] sm:$0xf] }
  0x9e   :  { %1334 = vmatpush.bf16.msrb.mxu3 %v2197_v56  ;;  %v2041_v21 = vor.u32 %v2413_v17, %v2040_v5  ;;  %v294_v5 = vperm.slane %v2707_v44, 1 }
  0x9f   :  { %1576 = vmatpush.bf16.msrb.mxu0 %v2470_v58 }
  0xa0   :  { %1323 = vmatpush.bf16.msra.mxu1 %v2077_v2 }
  0xa1   :  { %1563 = vmatpush.bf16.msrb.mxu2 %v2462_v10  ;;  %v2467_v10 = vld [vmem:[#allocation8 + $0x58] sm:$0xff] }
  0xa2   :  { %1335 = vmatpush.bf16.msrb.mxu3 %v2185_v1  ;;  %v2469_v1 = vld [vmem:[#allocation8 + $0x68] sm:$0xff] }
  0xa3   :  { %1577 = vmatpush.bf16.msrb.mxu0 %v2469_v1 }
  0xa4   :  { %1324 = vmatpush.bf16.msra.mxu1 %v2065_v60 }
  0xa5   :  { %1564 = vmatpush.bf16.msrb.mxu2 %v2461_v18 }
  0xa6   :  { %1336 = vmatpush.bf16.msrb.mxu3 %v2173_v8  ;;  %2212 = vmatmul.msk.bf16.vlgmr.msra.gmra.mxu0 %vm1083_vm0, %v2681_v45  ;;  %v2113_v45 = vor.u32 %v2431_v38, %v2112_v37  ;;  %v2475_v38 = vld [vmem:[#allocation8 + $0x98] sm:$0xff] }
  0xa7   :  { %1578 = vmatpush.bf16.msrb.mxu0 %v2468_v4 }
  0xa8   :  { %1325 = vmatpush.bf16.msra.mxu1 %v2053_v14  ;;  %v2464_v14 = vld [vmem:[#allocation8 + $0x40] sm:$0xff] }
  0xa9   :  { %1565 = vmatpush.bf16.msrb.mxu2 %v2460_v19  ;;  %v2478_v19 = vld [vmem:[#allocation8 + $0xb0] sm:$0xff] }
  0xaa   :  { %1337 = vmatpush.bf16.msrb.mxu3 %v2161_v13  ;;  %v2465_v13 = vld [vmem:[#allocation8 + $0x48] sm:$0xff] }
  0xab   :  { %1579 = vmatpush.bf16.msrb.mxu0 %v2467_v10 }
  0xac   :  { %1326 = vmatpush.bf16.msra.mxu1 %v2041_v21 }
  0xad   :  { %1566 = vmatpush.bf16.msrb.mxu2 %v2459_v33 }
  0xae   :  { %1338 = vmatpush.bf16.msrb.mxu3 %v2149_v20 }
  0xaf   :  { %1580 = vmatpush.bf16.msrb.mxu0 %v2466_v53 }
  0xb0   :  { %1327 = vmatpush.bf16.msra.mxu1 %v2029_v27 }
  0xb1   :  { %1567 = vmatpush.bf16.msrb.mxu2 %v2458_v39 }
  0xb2   :  { %1339 = vmatpush.bf16.msrb.mxu3 %v2137_v26 }
  0xb3   :  { %v1096_v40 = vpop.f32.mrf.mxu0  ;;  %1581 = vmatpush.bf16.msrb.mxu0 %v2465_v13 }
  0xb4   :  { %1328 = vmatpush.bf16.msra.mxu1 %v2017_v36  ;;  %v1109_v42 = vpop.f32.mrf.mxu1 }
  0xb5   :  { %1568 = vmatpush.bf16.msrb.mxu2 %v2457_v41 }
  0xb6   :  { %1340 = vmatpush.bf16.msrb.mxu3 %v2125_v34 }
  0xb7   :  { %1329 = vmatmul.bf16.vlgmr.msra.gmra.mxu1 %v2685_v30  ;;  %v1097_v30 = vadd.f32 %v1096_v40, %v293_v48  ;;  %1582 = vmatpush.bf16.msrb.mxu0 %v2464_v14  ;;  %v2474_v40 = vld [vmem:[#allocation8 + $0x90] sm:$0xff] }
  0xb8   :  { %1588 = vmatpush.bf16.msrb.mxu1 %v2479_v24 }
  0xb9   :  { %1569 = vmatpush.bf16.msrb.mxu2 %v2456_v43  ;;  %v2473_v43 = vld [vmem:[#allocation8 + $0x88] sm:$0xff] }
  0xba   :  { %1341 = vmatpush.bf16.msrb.mxu3 %v2113_v45 }
  0xbb   :  { %v1122_v46 = vpop.f32.mrf.mxu2  ;;  %v1098_v47 = vpop.f32.mrf.mxu0 }
  0xbc   :  { %v1111_v49 = vpop.f32.mrf.mxu1  ;;  %v1135_v51 = vpop.f32.mrf.mxu3  ;;  %1589 = vmatpush.bf16.msrb.mxu1 %v2478_v19 }
  0xbd   :  { %1342 = vmatmul.bf16.vlgmr.msrb.gmra.mxu3 %v2687_v35  ;;  %v1110_v35 = vadd.f32 %v1109_v42, %v1097_v30  ;;  %v2472_v49 = vld [vmem:[#allocation8 + $0x80] sm:$0xff] }
  0xbf   :  { %v1123_v54 = vadd.f32 %v1122_v46, %v1110_v35 }
  0xc0   :  { %1590 = vmatpush.bf16.msrb.mxu1 %v2477_v28 }
  0xc1   :  { %v1136_v57 = vadd.f32 %v1135_v51, %v1123_v54  ;;  %v295_v51 = vperm.slane %v2707_v44, 2 }
  0xc3   :  { %v1124_v52 = vpop.f32.mrf.mxu2 }
  0xc4   :  { %v1137_v55 = vpop.f32.mrf.mxu3  ;;  %1591 = vmatpush.bf16.msrb.mxu1 %v2476_v32 }
  0xc8   :  { %1592 = vmatpush.bf16.msrb.mxu1 %v2475_v38 }
  0xcb   :  { %v1174_v56 = vpop.f32.mrf.mxu2 }
  0xcc   :  { %1593 = vmatpush.bf16.msrb.mxu1 %v2474_v40 }
  0xd0   :  { %1594 = vmatpush.bf16.msrb.mxu1 %v2473_v43 }
  0xd3   :  { %v1148_v59 = vpop.f32.mrf.mxu0  ;;  %v1176_v63 = vpop.f32.mrf.mxu2 }
  0xd4   :  { %v1149_v61 = vadd.f32 %v1148_v59, %v1136_v57  ;;  %v1161_v62 = vpop.f32.mrf.mxu1  ;;  %1595 = vmatpush.bf16.msrb.mxu1 %v2472_v49 }
  0xd6   :  { %v1162_v0 = vadd.f32 %v1161_v62, %v1149_v61 }
  0xd8   :  { %v1175_v2 = vadd.f32 %v1174_v56, %v1162_v0 }
  0xda   :  { %v1360_v3 = vmax.f32 %v1175_v2, 0.0 }
  0xdb   :  { %v1150_v7 = vpop.f32.mrf.mxu0 }
  0xdc   :  { %v1187_v6 = vpop.f32.mrf.mxu3  ;;  %v1363_v8 = vpack.c.bf16 %v1360_v3, %v1360_v3  ;;  %v1163_v60 = vpop.f32.mrf.mxu1 }
  0xdd   :  { %v1188_v17 = vadd.f32 %v1187_v6, %v294_v5  ;;  %v2489_v60 = vld [vmem:[%s2722_s4] ss:$0 sm:$0xff] }
  0xde   :  { %1570 = vmatmul.bf16.vlgmr.msrb.gmra.mxu2 %v1363_v8 }
  0xdf   :  { %v1200_v9 = vpop.f32.mrf.mxu2 }
  0xe0   :  { %v1201_v23 = vadd.f32 %v1200_v9, %v1188_v17 }
  0xe4   :  { %v1189_v11 = vpop.f32.mrf.mxu3 }
  0xe7   :  { %v1202_v12 = vpop.f32.mrf.mxu2 }
  0xf3   :  { %v1213_v15 = vpop.f32.mrf.mxu0 }
  0xf4   :  { %v1226_v16 = vpop.f32.mrf.mxu1  ;;  %v1214_v25 = vadd.f32 %v1213_v15, %v1201_v23 }
  0xf6   :  { %v1227_v27 = vadd.f32 %v1226_v16, %v1214_v25 }
  0xfb   :  { %v1215_v20 = vpop.f32.mrf.mxu0 }
  0xfc   :  { %v1239_v18 = vpop.f32.mrf.mxu3  ;;  %v1228_v22 = vpop.f32.mrf.mxu1 }
  0xfd   :  { %v1240_v31 = vadd.f32 %v1239_v18, %v1227_v27 }
  0xff   :  { %v1252_v21 = vpop.f32.mrf.mxu2 }
 0x100   :  { %v1253_v33 = vadd.f32 %v1252_v21, %v1240_v31 }
 0x104   :  { %v1241_v26 = vpop.f32.mrf.mxu3 }
 0x107   :  { %v1254_v29 = vpop.f32.mrf.mxu2 }
 0x10c   :  { %v1265_v34 = vpop.f32.mrf.mxu3 }
 0x10d   :  { %v1266_v36 = vadd.f32 %v1265_v34, %v1253_v33 }
 0x10f   :  { %v1361_v37 = vmax.f32 %v1266_v36, 0.0 }
 0x111   :  { %v1364_v45 = vpack.c.bf16 %v1361_v37, %v1361_v37 }
 0x113   :  { %1583 = vmatmul.bf16.vlgmr.msrb.gmra.mxu0 %v1364_v45  ;;  %v1304_v41 = vpop.f32.mrf.mxu0 }
 0x114   :  { %v1278_v39 = vpop.f32.mrf.mxu1  ;;  %v1267_v42 = vpop.f32.mrf.mxu3 }
 0x115   :  { %v1279_v54 = vadd.f32 %v1278_v39, %v295_v51 }
 0x11b   :  { %v1306_v47 = vpop.f32.mrf.mxu0 }
 0x11c   :  { %v1280_v46 = vpop.f32.mrf.mxu1 }
 0x11f   :  { %v1317_v50 = vpop.f32.mrf.mxu2 }
 0x120   :  { %v1291_v48 = vpop.f32.mrf.mxu3 }
 0x121   :  { %v1292_v56 = vadd.f32 %v1291_v48, %v1279_v54 }
 0x123   :  { %v1356_v30 = vpop.f32.mrf.mxu0  ;;  %v1305_v58 = vadd.f32 %v1304_v41, %v1292_v56 }
 0x125   :  { %v1318_v59 = vadd.f32 %v1317_v50, %v1305_v58 }
 0x127   :  { %v1319_v35 = vpop.f32.mrf.mxu2 }
 0x128   :  { %v1293_v52 = vpop.f32.mrf.mxu3 }
 0x12b   :  { %v1358_v55 = vpop.f32.mrf.mxu0 }
 0x134   :  { %v1330_v57 = vpop.f32.mrf.mxu1 }
 0x135   :  { %v1331_v62 = vadd.f32 %v1330_v57, %v1318_v59 }
 0x13c   :  { %v1332_v61 = vpop.f32.mrf.mxu1 }
 0x140   :  { %v1343_v63 = vpop.f32.mrf.mxu3 }
 0x141   :  { %v1344_v0 = vadd.f32 %v1343_v63, %v1331_v62 }
 0x143   :  { %v1357_v1 = vadd.f32 %v1356_v30, %v1344_v0 }
 0x145   :  { %v1362_v2 = vmax.f32 %v1357_v1, 0.0 }
 0x147   :  { %v1365_v3 = vpack.c.bf16 %v1362_v2, %v1362_v2 }
 0x148   :  { %v1345_v4 = vpop.f32.mrf.mxu3 }
 0x149   :  { %1596 = vmatmul.bf16.vlgmr.msrb.gmra.mxu1 %v1365_v3 }
 0x161   :  { %v1571_v6 = vpop.f32.mrf.mxu2 }
 0x162   :  { %v1572_v9 = vadd.f32 %v2489_v60, %v1571_v6 }
 0x169   :  { %v1573_v7 = vpop.f32.mrf.mxu2 }
 0x190   :  { %v1584_v44 = vpop.f32.mrf.mxu0 }
 0x191   :  { %v1585_v10 = vadd.f32 %v1584_v44, %v1572_v9 }
 0x198   :  { %v1586_v8 = vpop.f32.mrf.mxu0 }
 0x1c6   :  { %v1597_v53 = vpop.f32.mrf.mxu1 }
 0x1c7   :  { %v1598_v11 = vadd.f32 %v1597_v53, %v1585_v10 }
 0x1c9   :  { %v1601_v12 = vmax.f32 %v1598_v11, 0.0 }
 0x1cb   :  { %1602 = vst [vmem:[#allocation10] sm:$0xff] %v1601_v12 }
 0x1cc   :  { %1613 = dma.vmem_to_hbm [thread:$0]  %s1609_s16, 128, %s1611_s19, [#allocation4]  }
 0x1ce   :  { %v1599_v13 = vpop.f32.mrf.mxu1 }
 0x1cf   :  { %2616 = dma.done.wait [#allocation4], 128  }
 0x1d0   :  { %2617 = vsyncadd [#allocation4], 4294967168 }
 0x1d1   :  { %1618 = vsyncpa [#allocation3], 1 }
 0x1d2   :  { %1619 = vsyncpa [#allocation6], 1 }
 0x1d3   :  { %1620 = vsyncpa [#allocation9], 1 }
 0x1d4   :  { %1621 = vsyncpa [#allocation4], 1 }

</bundles_post_ra>
